<compile_context>
chip_gen: v7x
topology: tpu7x:2x2x1
jax: 0.10.0
libtpu: 0.0.40
codegen_flags: <defaults>
</compile_context>

<pallas_src>
import functools

import jax
import jax.numpy as jnp
from jax import lax
from jax.experimental import pallas as pl
from jax.experimental.pallas import tpu as pltpu

EPS = 1e-5


def _resblock_kernel(x_ref, mask_ref, w1_ref, g1_ref, b1_ref,
                     w2_ref, g2_ref, b2_ref, o_ref, *, width):
    # x_ref:    (1, C, HW)  one image, channels on sublanes, flattened spatial on lanes
    # mask_ref: (9, 1, HW)  per-tap zero-padding masks (static, precomputed)
    # w*_ref:   (9, C, C)   per-tap (Cout, Cin) weight slabs
    # g*/b*:    (C, 1)      instance-norm affine params
    # o_ref:    (1, C, HW)
    C = x_ref.shape[1]
    HW = x_ref.shape[2]
    x = x_ref[0].astype(jnp.float32)  # (C, HW)

    def conv3x3(src, w_ref):
        acc = jnp.zeros((C, HW), jnp.float32)
        for k in range(9):
            dy, dx = k // 3 - 1, k % 3 - 1
            s = dy * width + dx  # flattened spatial shift for this tap
            if s == 0:
                patch = src  # center tap: mask is all ones
            else:
                # shifted[p] = src[p + s] (wrap), then zero out-of-image positions
                patch = pltpu.roll(src, (-s) % HW, axis=1) * mask_ref[k]
            acc = acc + jnp.dot(w_ref[k], patch,
                                preferred_element_type=jnp.float32)
        return acc  # (C, HW)

    def instance_norm(y, g_ref, b_ref):
        mean = jnp.mean(y, axis=1, keepdims=True)                    # (C, 1)
        var = jnp.mean(jnp.square(y - mean), axis=1, keepdims=True)  # biased
        yn = (y - mean) * lax.rsqrt(var + EPS)
        return yn * g_ref[...] + b_ref[...]                          # lane-broadcast

    t1 = jnp.maximum(instance_norm(conv3x3(x, w1_ref), g1_ref, b1_ref), 0.0)
    t2 = instance_norm(conv3x3(t1, w2_ref), g2_ref, b2_ref)
    o_ref[0] = (x + t2).astype(o_ref.dtype)


@jax.jit
def residual_block(x_nchw, w1, g1, b1, w2, g2, b2):
    """x_nchw: (N, C, H, W) float32; conv weights in HWIO (3, 3, Cin, Cout)."""
    N, C, H, W = x_nchw.shape
    HW = H * W
    x2 = x_nchw.reshape(N, C, HW).astype(jnp.float32)  # free contiguous reshape

    def pack_w(w):  # HWIO (3,3,Cin,Cout) -> (9, Cout, Cin), k = ky*3 + kx
        return jnp.transpose(w, (0, 1, 3, 2)).reshape(9, C, C).astype(jnp.float32)

    w1p, w2p = pack_w(w1), pack_w(w2)
    g1c, b1c = g1.reshape(C, 1).astype(jnp.float32), b1.reshape(C, 1).astype(jnp.float32)
    g2c, b2c = g2.reshape(C, 1).astype(jnp.float32), b2.reshape(C, 1).astype(jnp.float32)

    # Static per-tap validity masks over the flattened spatial axis (model zero padding).
    yy = jnp.arange(H).reshape(H, 1)
    xx = jnp.arange(W).reshape(1, W)
    masks = []
    for k in range(9):
        dy, dx = k // 3 - 1, k % 3 - 1
        m = ((yy + dy >= 0) & (yy + dy < H) & (xx + dx >= 0) & (xx + dx < W))
        masks.append(m.astype(jnp.float32).reshape(1, HW))
    mask_arr = jnp.stack(masks, axis=0)  # (9, 1, HW)

    kern = functools.partial(_resblock_kernel, width=W)

    def full(shape):
        return pl.BlockSpec(shape, lambda n, _s=len(shape): (0,) * _s)

    out2 = pl.pallas_call(
        kern,
        out_shape=jax.ShapeDtypeStruct((N, C, HW), jnp.float32),
        grid_spec=pltpu.PrefetchScalarGridSpec(
            num_scalar_prefetch=0,
            grid=(N,),
            in_specs=[
                pl.BlockSpec((1, C, HW), lambda n: (n, 0, 0)),  # x (one image)
                full((9, 1, HW)),                               # tap masks
                full((9, C, C)), full((C, 1)), full((C, 1)),    # conv1 / IN1
                full((9, C, C)), full((C, 1)), full((C, 1)),    # conv2 / IN2
            ],
            out_specs=pl.BlockSpec((1, C, HW), lambda n: (n, 0, 0)),
        ),
        compiler_params=pltpu.CompilerParams(
            dimension_semantics=("parallel",)),
    )(x2, mask_arr, w1p, g1c, b1c, w2p, g2c, b2c)

    return out2.reshape(N, C, H, W)


# ---------------- pure-JAX reference for verification ----------------
def _ref_instance_norm(y, g, b):
    mean = jnp.mean(y, axis=(2, 3), keepdims=True)
    var = jnp.mean((y - mean) ** 2, axis=(2, 3), keepdims=True)
    return ((y - mean) * lax.rsqrt(var + EPS) * g.reshape(1, -1, 1, 1)
            + b.reshape(1, -1, 1, 1))


def _ref_forward(x, w1, g1, b1, w2, g2, b2):
    dn = ("NCHW", "HWIO", "NCHW")
    y = lax.conv_general_dilated(x, w1, (1, 1), "SAME", dimension_numbers=dn,
                                 precision=lax.Precision.HIGHEST)
    y = jnp.maximum(_ref_instance_norm(y, g1, b1), 0.0)
    y = lax.conv_general_dilated(y, w2, (1, 1), "SAME", dimension_numbers=dn,
                                 precision=lax.Precision.HIGHEST)
    y = _ref_instance_norm(y, g2, b2)
    return x + y


if __name__ == "__main__":
    key = jax.random.PRNGKey(0)
    N, C, H, W = 2, 4, 16, 16  # dim_in == dim_out (required by the residual add)

    k = jax.random.split(key, 7)
    x = jax.random.normal(k[0], (N, C, H, W), jnp.float32)
    scale = (2.0 / (9 * C)) ** 0.5
    w1 = jax.random.normal(k[1], (3, 3, C, C), jnp.float32) * scale
    w2 = jax.random.normal(k[2], (3, 3, C, C), jnp.float32) * scale
    g1 = 1.0 + 0.1 * jax.random.normal(k[3], (C,), jnp.float32)
    b1 = 0.1 * jax.random.normal(k[4], (C,), jnp.float32)
    g2 = 1.0 + 0.1 * jax.random.normal(k[5], (C,), jnp.float32)
    b2 = 0.1 * jax.random.normal(k[6], (C,), jnp.float32)

    out = jax.block_until_ready(residual_block(x, w1, g1, b1, w2, g2, b2))
    ref = jax.block_until_ready(_ref_forward(x, w1, g1, b1, w2, g2, b2))

    assert out.shape == (N, C, H, W)
    assert jnp.max(jnp.abs(out - ref)) < 1e-4, "mismatch vs reference"

    print("KERNEL_OK")
</pallas_src>

<mosaic_0001>
module attributes {stable_mosaic.version = 11 : i64} {
  func.func @_resblock_kernel(%arg0: i32, %arg1: memref<1x4x256xf32, #tpu.memory_space<vmem>>, %arg2: memref<9x1x256xf32, #tpu.memory_space<vmem>>, %arg3: memref<9x4x4xf32, #tpu.memory_space<vmem>>, %arg4: memref<4x1xf32, #tpu.memory_space<vmem>>, %arg5: memref<4x1xf32, #tpu.memory_space<vmem>>, %arg6: memref<9x4x4xf32, #tpu.memory_space<vmem>>, %arg7: memref<4x1xf32, #tpu.memory_space<vmem>>, %arg8: memref<4x1xf32, #tpu.memory_space<vmem>>, %arg9: memref<1x4x256xf32, #tpu.memory_space<vmem>>) attributes {dimension_semantics = [#tpu.dimension_semantics<parallel>], iteration_bounds = array<i64: 2>, scalar_prefetch = 0 : i64, scratch_operands = 0 : i64, tpu.core_type = #tpu.core_type<tc>, window_params = [{transform_indices = @transform_0, window_bounds = array<i64: 1, 4, 256>}, {pipeline_mode = #tpu.pipeline_mode<synchronous>, transform_indices = @transform_1, window_bounds = array<i64: 9, 1, 256>}, {pipeline_mode = #tpu.pipeline_mode<synchronous>, transform_indices = @transform_2, window_bounds = array<i64: 9, 4, 4>}, {pipeline_mode = #tpu.pipeline_mode<synchronous>, transform_indices = @transform_3, window_bounds = array<i64: 4, 1>}, {pipeline_mode = #tpu.pipeline_mode<synchronous>, transform_indices = @transform_4, window_bounds = array<i64: 4, 1>}, {pipeline_mode = #tpu.pipeline_mode<synchronous>, transform_indices = @transform_5, window_bounds = array<i64: 9, 4, 4>}, {pipeline_mode = #tpu.pipeline_mode<synchronous>, transform_indices = @transform_6, window_bounds = array<i64: 4, 1>}, {pipeline_mode = #tpu.pipeline_mode<synchronous>, transform_indices = @transform_7, window_bounds = array<i64: 4, 1>}, {transform_indices = @transform_8, window_bounds = array<i64: 1, 4, 256>}]} {
    %c0 = arith.constant 0 : index
    %c0_0 = arith.constant 0 : index
    %c0_1 = arith.constant 0 : index
    %0 = vector.load %arg1[%c0, %c0_0, %c0_1] : memref<1x4x256xf32, #tpu.memory_space<vmem>>, vector<1x4x256xf32>
    %1 = vector.shape_cast %0 : vector<1x4x256xf32> to vector<4x256xf32>
    %cst = arith.constant 0.000000e+00 : f32
    %2 = vector.broadcast %cst : f32 to vector<4x256xf32>
    %c17_i32 = arith.constant 17 : i32
    %3 = tpu.dynamic_rotate %1 by %c17_i32 dim 1 : vector<4x256xf32>, i32 -> vector<4x256xf32>
    %c0_2 = arith.constant 0 : index
    %c0_3 = arith.constant 0 : index
    %c0_4 = arith.constant 0 : index
    %4 = vector.load %arg2[%c0_2, %c0_3, %c0_4] : memref<9x1x256xf32, #tpu.memory_space<vmem>>, vector<1x1x256xf32>
    %5 = vector.shape_cast %4 : vector<1x1x256xf32> to vector<1x256xf32>
    %6 = vector.broadcast %5 : vector<1x256xf32> to vector<4x256xf32>
    %7 = arith.mulf %3, %6 : vector<4x256xf32>
    %c0_5 = arith.constant 0 : index
    %c0_6 = arith.constant 0 : index
    %c0_7 = arith.constant 0 : index
    %8 = vector.load %arg3[%c0_5, %c0_6, %c0_7] : memref<9x4x4xf32, #tpu.memory_space<vmem>>, vector<1x4x4xf32>
    %9 = vector.shape_cast %8 : vector<1x4x4xf32> to vector<4x4xf32>
    %cst_8 = arith.constant dense<0.000000e+00> : vector<4x256xf32>
    %10 = tpu.matmul %9, %7, %cst_8 {dimension_numbers = #tpu.dot_dimension_numbers<[1], [0], [0], [1], [0, 0, 1, 1], [], []>} : vector<4x4xf32>, vector<4x256xf32>, vector<4x256xf32> -> vector<4x256xf32>
    %11 = arith.addf %2, %10 : vector<4x256xf32>
    %c16_i32 = arith.constant 16 : i32
    %12 = tpu.dynamic_rotate %1 by %c16_i32 dim 1 : vector<4x256xf32>, i32 -> vector<4x256xf32>
    %c1 = arith.constant 1 : index
    %c0_9 = arith.constant 0 : index
    %c0_10 = arith.constant 0 : index
    %13 = vector.load %arg2[%c1, %c0_9, %c0_10] : memref<9x1x256xf32, #tpu.memory_space<vmem>>, vector<1x1x256xf32>
    %14 = vector.shape_cast %13 : vector<1x1x256xf32> to vector<1x256xf32>
    %15 = vector.broadcast %14 : vector<1x256xf32> to vector<4x256xf32>
    %16 = arith.mulf %12, %15 : vector<4x256xf32>
    %c1_11 = arith.constant 1 : index
    %c0_12 = arith.constant 0 : index
    %c0_13 = arith.constant 0 : index
    %17 = vector.load %arg3[%c1_11, %c0_12, %c0_13] : memref<9x4x4xf32, #tpu.memory_space<vmem>>, vector<1x4x4xf32>
    %18 = vector.shape_cast %17 : vector<1x4x4xf32> to vector<4x4xf32>
    %cst_14 = arith.constant dense<0.000000e+00> : vector<4x256xf32>
    %19 = tpu.matmul %18, %16, %cst_14 {dimension_numbers = #tpu.dot_dimension_numbers<[1], [0], [0], [1], [0, 0, 1, 1], [], []>} : vector<4x4xf32>, vector<4x256xf32>, vector<4x256xf32> -> vector<4x256xf32>
    %20 = arith.addf %11, %19 : vector<4x256xf32>
    %c15_i32 = arith.constant 15 : i32
    %21 = tpu.dynamic_rotate %1 by %c15_i32 dim 1 : vector<4x256xf32>, i32 -> vector<4x256xf32>
    %c2 = arith.constant 2 : index
    %c0_15 = arith.constant 0 : index
    %c0_16 = arith.constant 0 : index
    %22 = vector.load %arg2[%c2, %c0_15, %c0_16] : memref<9x1x256xf32, #tpu.memory_space<vmem>>, vector<1x1x256xf32>
    %23 = vector.shape_cast %22 : vector<1x1x256xf32> to vector<1x256xf32>
    %24 = vector.broadcast %23 : vector<1x256xf32> to vector<4x256xf32>
    %25 = arith.mulf %21, %24 : vector<4x256xf32>
    %c2_17 = arith.constant 2 : index
    %c0_18 = arith.constant 0 : index
    %c0_19 = arith.constant 0 : index
    %26 = vector.load %arg3[%c2_17, %c0_18, %c0_19] : memref<9x4x4xf32, #tpu.memory_space<vmem>>, vector<1x4x4xf32>
    %27 = vector.shape_cast %26 : vector<1x4x4xf32> to vector<4x4xf32>
    %cst_20 = arith.constant dense<0.000000e+00> : vector<4x256xf32>
    %28 = tpu.matmul %27, %25, %cst_20 {dimension_numbers = #tpu.dot_dimension_numbers<[1], [0], [0], [1], [0, 0, 1, 1], [], []>} : vector<4x4xf32>, vector<4x256xf32>, vector<4x256xf32> -> vector<4x256xf32>
    %29 = arith.addf %20, %28 : vector<4x256xf32>
    %c1_i32 = arith.constant 1 : i32
    %30 = tpu.dynamic_rotate %1 by %c1_i32 dim 1 : vector<4x256xf32>, i32 -> vector<4x256xf32>
    %c3 = arith.constant 3 : index
    %c0_21 = arith.constant 0 : index
    %c0_22 = arith.constant 0 : index
    %31 = vector.load %arg2[%c3, %c0_21, %c0_22] : memref<9x1x256xf32, #tpu.memory_space<vmem>>, vector<1x1x256xf32>
    %32 = vector.shape_cast %31 : vector<1x1x256xf32> to vector<1x256xf32>
    %33 = vector.broadcast %32 : vector<1x256xf32> to vector<4x256xf32>
    %34 = arith.mulf %30, %33 : vector<4x256xf32>
    %c3_23 = arith.constant 3 : index
    %c0_24 = arith.constant 0 : index
    %c0_25 = arith.constant 0 : index
    %35 = vector.load %arg3[%c3_23, %c0_24, %c0_25] : memref<9x4x4xf32, #tpu.memory_space<vmem>>, vector<1x4x4xf32>
    %36 = vector.shape_cast %35 : vector<1x4x4xf32> to vector<4x4xf32>
    %cst_26 = arith.constant dense<0.000000e+00> : vector<4x256xf32>
    %37 = tpu.matmul %36, %34, %cst_26 {dimension_numbers = #tpu.dot_dimension_numbers<[1], [0], [0], [1], [0, 0, 1, 1], [], []>} : vector<4x4xf32>, vector<4x256xf32>, vector<4x256xf32> -> vector<4x256xf32>
    %38 = arith.addf %29, %37 : vector<4x256xf32>
    %c4 = arith.constant 4 : index
    %c0_27 = arith.constant 0 : index
    %c0_28 = arith.constant 0 : index
    %39 = vector.load %arg3[%c4, %c0_27, %c0_28] : memref<9x4x4xf32, #tpu.memory_space<vmem>>, vector<1x4x4xf32>
    %40 = vector.shape_cast %39 : vector<1x4x4xf32> to vector<4x4xf32>
    %cst_29 = arith.constant dense<0.000000e+00> : vector<4x256xf32>
    %41 = tpu.matmul %40, %1, %cst_29 {dimension_numbers = #tpu.dot_dimension_numbers<[1], [0], [0], [1], [0, 0, 1, 1], [], []>} : vector<4x4xf32>, vector<4x256xf32>, vector<4x256xf32> -> vector<4x256xf32>
    %42 = arith.addf %38, %41 : vector<4x256xf32>
    %c255_i32 = arith.constant 255 : i32
    %43 = tpu.dynamic_rotate %1 by %c255_i32 dim 1 : vector<4x256xf32>, i32 -> vector<4x256xf32>
    %c5 = arith.constant 5 : index
    %c0_30 = arith.constant 0 : index
    %c0_31 = arith.constant 0 : index
    %44 = vector.load %arg2[%c5, %c0_30, %c0_31] : memref<9x1x256xf32, #tpu.memory_space<vmem>>, vector<1x1x256xf32>
    %45 = vector.shape_cast %44 : vector<1x1x256xf32> to vector<1x256xf32>
    %46 = vector.broadcast %45 : vector<1x256xf32> to vector<4x256xf32>
    %47 = arith.mulf %43, %46 : vector<4x256xf32>
    %c5_32 = arith.constant 5 : index
    %c0_33 = arith.constant 0 : index
    %c0_34 = arith.constant 0 : index
    %48 = vector.load %arg3[%c5_32, %c0_33, %c0_34] : memref<9x4x4xf32, #tpu.memory_space<vmem>>, vector<1x4x4xf32>
    %49 = vector.shape_cast %48 : vector<1x4x4xf32> to vector<4x4xf32>
    %cst_35 = arith.constant dense<0.000000e+00> : vector<4x256xf32>
    %50 = tpu.matmul %49, %47, %cst_35 {dimension_numbers = #tpu.dot_dimension_numbers<[1], [0], [0], [1], [0, 0, 1, 1], [], []>} : vector<4x4xf32>, vector<4x256xf32>, vector<4x256xf32> -> vector<4x256xf32>
    %51 = arith.addf %42, %50 : vector<4x256xf32>
    %c241_i32 = arith.constant 241 : i32
    %52 = tpu.dynamic_rotate %1 by %c241_i32 dim 1 : vector<4x256xf32>, i32 -> vector<4x256xf32>
    %c6 = arith.constant 6 : index
    %c0_36 = arith.constant 0 : index
    %c0_37 = arith.constant 0 : index
    %53 = vector.load %arg2[%c6, %c0_36, %c0_37] : memref<9x1x256xf32, #tpu.memory_space<vmem>>, vector<1x1x256xf32>
    %54 = vector.shape_cast %53 : vector<1x1x256xf32> to vector<1x256xf32>
    %55 = vector.broadcast %54 : vector<1x256xf32> to vector<4x256xf32>
    %56 = arith.mulf %52, %55 : vector<4x256xf32>
    %c6_38 = arith.constant 6 : index
    %c0_39 = arith.constant 0 : index
    %c0_40 = arith.constant 0 : index
    %57 = vector.load %arg3[%c6_38, %c0_39, %c0_40] : memref<9x4x4xf32, #tpu.memory_space<vmem>>, vector<1x4x4xf32>
    %58 = vector.shape_cast %57 : vector<1x4x4xf32> to vector<4x4xf32>
    %cst_41 = arith.constant dense<0.000000e+00> : vector<4x256xf32>
    %59 = tpu.matmul %58, %56, %cst_41 {dimension_numbers = #tpu.dot_dimension_numbers<[1], [0], [0], [1], [0, 0, 1, 1], [], []>} : vector<4x4xf32>, vector<4x256xf32>, vector<4x256xf32> -> vector<4x256xf32>
    %60 = arith.addf %51, %59 : vector<4x256xf32>
    %c240_i32 = arith.constant 240 : i32
    %61 = tpu.dynamic_rotate %1 by %c240_i32 dim 1 : vector<4x256xf32>, i32 -> vector<4x256xf32>
    %c7 = arith.constant 7 : index
    %c0_42 = arith.constant 0 : index
    %c0_43 = arith.constant 0 : index
    %62 = vector.load %arg2[%c7, %c0_42, %c0_43] : memref<9x1x256xf32, #tpu.memory_space<vmem>>, vector<1x1x256xf32>
    %63 = vector.shape_cast %62 : vector<1x1x256xf32> to vector<1x256xf32>
    %64 = vector.broadcast %63 : vector<1x256xf32> to vector<4x256xf32>
    %65 = arith.mulf %61, %64 : vector<4x256xf32>
    %c7_44 = arith.constant 7 : index
    %c0_45 = arith.constant 0 : index
    %c0_46 = arith.constant 0 : index
    %66 = vector.load %arg3[%c7_44, %c0_45, %c0_46] : memref<9x4x4xf32, #tpu.memory_space<vmem>>, vector<1x4x4xf32>
    %67 = vector.shape_cast %66 : vector<1x4x4xf32> to vector<4x4xf32>
    %cst_47 = arith.constant dense<0.000000e+00> : vector<4x256xf32>
    %68 = tpu.matmul %67, %65, %cst_47 {dimension_numbers = #tpu.dot_dimension_numbers<[1], [0], [0], [1], [0, 0, 1, 1], [], []>} : vector<4x4xf32>, vector<4x256xf32>, vector<4x256xf32> -> vector<4x256xf32>
    %69 = arith.addf %60, %68 : vector<4x256xf32>
    %c239_i32 = arith.constant 239 : i32
    %70 = tpu.dynamic_rotate %1 by %c239_i32 dim 1 : vector<4x256xf32>, i32 -> vector<4x256xf32>
    %c8 = arith.constant 8 : index
    %c0_48 = arith.constant 0 : index
    %c0_49 = arith.constant 0 : index
    %71 = vector.load %arg2[%c8, %c0_48, %c0_49] : memref<9x1x256xf32, #tpu.memory_space<vmem>>, vector<1x1x256xf32>
    %72 = vector.shape_cast %71 : vector<1x1x256xf32> to vector<1x256xf32>
    %73 = vector.broadcast %72 : vector<1x256xf32> to vector<4x256xf32>
    %74 = arith.mulf %70, %73 : vector<4x256xf32>
    %c8_50 = arith.constant 8 : index
    %c0_51 = arith.constant 0 : index
    %c0_52 = arith.constant 0 : index
    %75 = vector.load %arg3[%c8_50, %c0_51, %c0_52] : memref<9x4x4xf32, #tpu.memory_space<vmem>>, vector<1x4x4xf32>
    %76 = vector.shape_cast %75 : vector<1x4x4xf32> to vector<4x4xf32>
    %cst_53 = arith.constant dense<0.000000e+00> : vector<4x256xf32>
    %77 = tpu.matmul %76, %74, %cst_53 {dimension_numbers = #tpu.dot_dimension_numbers<[1], [0], [0], [1], [0, 0, 1, 1], [], []>} : vector<4x4xf32>, vector<4x256xf32>, vector<4x256xf32> -> vector<4x256xf32>
    %78 = arith.addf %69, %77 : vector<4x256xf32>
    %cst_54 = arith.constant dense<0.000000e+00> : vector<4xf32>
    %79 = vector.multi_reduction <add>, %78, %cst_54 [1] : vector<4x256xf32> to vector<4xf32>
    %80 = vector.shape_cast %79 : vector<4xf32> to vector<4x1xf32>
    %cst_55 = arith.constant 2.560000e+02 : f32
    %81 = vector.broadcast %cst_55 : f32 to vector<4x1xf32>
    %82 = arith.divf %80, %81 : vector<4x1xf32>
    %83 = vector.broadcast %82 : vector<4x1xf32> to vector<4x256xf32>
    %84 = arith.subf %78, %83 : vector<4x256xf32>
    %85 = arith.mulf %84, %84 : vector<4x256xf32>
    %cst_56 = arith.constant dense<0.000000e+00> : vector<4xf32>
    %86 = vector.multi_reduction <add>, %85, %cst_56 [1] : vector<4x256xf32> to vector<4xf32>
    %87 = vector.shape_cast %86 : vector<4xf32> to vector<4x1xf32>
    %cst_57 = arith.constant 2.560000e+02 : f32
    %88 = vector.broadcast %cst_57 : f32 to vector<4x1xf32>
    %89 = arith.divf %87, %88 : vector<4x1xf32>
    %90 = vector.broadcast %82 : vector<4x1xf32> to vector<4x256xf32>
    %91 = arith.subf %78, %90 : vector<4x256xf32>
    %cst_58 = arith.constant 9.99999974E-6 : f32
    %92 = vector.broadcast %cst_58 : f32 to vector<4x1xf32>
    %93 = arith.addf %89, %92 : vector<4x1xf32>
    %94 = math.rsqrt %93 : vector<4x1xf32>
    %95 = vector.broadcast %94 : vector<4x1xf32> to vector<4x256xf32>
    %96 = arith.mulf %91, %95 : vector<4x256xf32>
    %c0_59 = arith.constant 0 : index
    %c0_60 = arith.constant 0 : index
    %97 = vector.load %arg4[%c0_59, %c0_60] : memref<4x1xf32, #tpu.memory_space<vmem>>, vector<4x1xf32>
    %98 = vector.broadcast %97 : vector<4x1xf32> to vector<4x256xf32>
    %99 = arith.mulf %96, %98 : vector<4x256xf32>
    %c0_61 = arith.constant 0 : index
    %c0_62 = arith.constant 0 : index
    %100 = vector.load %arg5[%c0_61, %c0_62] : memref<4x1xf32, #tpu.memory_space<vmem>>, vector<4x1xf32>
    %101 = vector.broadcast %100 : vector<4x1xf32> to vector<4x256xf32>
    %102 = arith.addf %99, %101 : vector<4x256xf32>
    %cst_63 = arith.constant 0.000000e+00 : f32
    %103 = vector.broadcast %cst_63 : f32 to vector<4x256xf32>
    %104 = arith.maximumf %102, %103 : vector<4x256xf32>
    %cst_64 = arith.constant 0.000000e+00 : f32
    %105 = vector.broadcast %cst_64 : f32 to vector<4x256xf32>
    %c17_i32_65 = arith.constant 17 : i32
    %106 = tpu.dynamic_rotate %104 by %c17_i32_65 dim 1 : vector<4x256xf32>, i32 -> vector<4x256xf32>
    %c0_66 = arith.constant 0 : index
    %c0_67 = arith.constant 0 : index
    %c0_68 = arith.constant 0 : index
    %107 = vector.load %arg2[%c0_66, %c0_67, %c0_68] : memref<9x1x256xf32, #tpu.memory_space<vmem>>, vector<1x1x256xf32>
    %108 = vector.shape_cast %107 : vector<1x1x256xf32> to vector<1x256xf32>
    %109 = vector.broadcast %108 : vector<1x256xf32> to vector<4x256xf32>
    %110 = arith.mulf %106, %109 : vector<4x256xf32>
    %c0_69 = arith.constant 0 : index
    %c0_70 = arith.constant 0 : index
    %c0_71 = arith.constant 0 : index
    %111 = vector.load %arg6[%c0_69, %c0_70, %c0_71] : memref<9x4x4xf32, #tpu.memory_space<vmem>>, vector<1x4x4xf32>
    %112 = vector.shape_cast %111 : vector<1x4x4xf32> to vector<4x4xf32>
    %cst_72 = arith.constant dense<0.000000e+00> : vector<4x256xf32>
    %113 = tpu.matmul %112, %110, %cst_72 {dimension_numbers = #tpu.dot_dimension_numbers<[1], [0], [0], [1], [0, 0, 1, 1], [], []>} : vector<4x4xf32>, vector<4x256xf32>, vector<4x256xf32> -> vector<4x256xf32>
    %114 = arith.addf %105, %113 : vector<4x256xf32>
    %c16_i32_73 = arith.constant 16 : i32
    %115 = tpu.dynamic_rotate %104 by %c16_i32_73 dim 1 : vector<4x256xf32>, i32 -> vector<4x256xf32>
    %c1_74 = arith.constant 1 : index
    %c0_75 = arith.constant 0 : index
    %c0_76 = arith.constant 0 : index
    %116 = vector.load %arg2[%c1_74, %c0_75, %c0_76] : memref<9x1x256xf32, #tpu.memory_space<vmem>>, vector<1x1x256xf32>
    %117 = vector.shape_cast %116 : vector<1x1x256xf32> to vector<1x256xf32>
    %118 = vector.broadcast %117 : vector<1x256xf32> to vector<4x256xf32>
    %119 = arith.mulf %115, %118 : vector<4x256xf32>
    %c1_77 = arith.constant 1 : index
    %c0_78 = arith.constant 0 : index
    %c0_79 = arith.constant 0 : index
    %120 = vector.load %arg6[%c1_77, %c0_78, %c0_79] : memref<9x4x4xf32, #tpu.memory_space<vmem>>, vector<1x4x4xf32>
    %121 = vector.shape_cast %120 : vector<1x4x4xf32> to vector<4x4xf32>
    %cst_80 = arith.constant dense<0.000000e+00> : vector<4x256xf32>
    %122 = tpu.matmul %121, %119, %cst_80 {dimension_numbers = #tpu.dot_dimension_numbers<[1], [0], [0], [1], [0, 0, 1, 1], [], []>} : vector<4x4xf32>, vector<4x256xf32>, vector<4x256xf32> -> vector<4x256xf32>
    %123 = arith.addf %114, %122 : vector<4x256xf32>
    %c15_i32_81 = arith.constant 15 : i32
    %124 = tpu.dynamic_rotate %104 by %c15_i32_81 dim 1 : vector<4x256xf32>, i32 -> vector<4x256xf32>
    %c2_82 = arith.constant 2 : index
    %c0_83 = arith.constant 0 : index
    %c0_84 = arith.constant 0 : index
    %125 = vector.load %arg2[%c2_82, %c0_83, %c0_84] : memref<9x1x256xf32, #tpu.memory_space<vmem>>, vector<1x1x256xf32>
    %126 = vector.shape_cast %125 : vector<1x1x256xf32> to vector<1x256xf32>
    %127 = vector.broadcast %126 : vector<1x256xf32> to vector<4x256xf32>
    %128 = arith.mulf %124, %127 : vector<4x256xf32>
    %c2_85 = arith.constant 2 : index
    %c0_86 = arith.constant 0 : index
    %c0_87 = arith.constant 0 : index
    %129 = vector.load %arg6[%c2_85, %c0_86, %c0_87] : memref<9x4x4xf32, #tpu.memory_space<vmem>>, vector<1x4x4xf32>
    %130 = vector.shape_cast %129 : vector<1x4x4xf32> to vector<4x4xf32>
    %cst_88 = arith.constant dense<0.000000e+00> : vector<4x256xf32>
    %131 = tpu.matmul %130, %128, %cst_88 {dimension_numbers = #tpu.dot_dimension_numbers<[1], [0], [0], [1], [0, 0, 1, 1], [], []>} : vector<4x4xf32>, vector<4x256xf32>, vector<4x256xf32> -> vector<4x256xf32>
    %132 = arith.addf %123, %131 : vector<4x256xf32>
    %c1_i32_89 = arith.constant 1 : i32
    %133 = tpu.dynamic_rotate %104 by %c1_i32_89 dim 1 : vector<4x256xf32>, i32 -> vector<4x256xf32>
    %c3_90 = arith.constant 3 : index
    %c0_91 = arith.constant 0 : index
    %c0_92 = arith.constant 0 : index
    %134 = vector.load %arg2[%c3_90, %c0_91, %c0_92] : memref<9x1x256xf32, #tpu.memory_space<vmem>>, vector<1x1x256xf32>
    %135 = vector.shape_cast %134 : vector<1x1x256xf32> to vector<1x256xf32>
    %136 = vector.broadcast %135 : vector<1x256xf32> to vector<4x256xf32>
    %137 = arith.mulf %133, %136 : vector<4x256xf32>
    %c3_93 = arith.constant 3 : index
    %c0_94 = arith.constant 0 : index
    %c0_95 = arith.constant 0 : index
    %138 = vector.load %arg6[%c3_93, %c0_94, %c0_95] : memref<9x4x4xf32, #tpu.memory_space<vmem>>, vector<1x4x4xf32>
    %139 = vector.shape_cast %138 : vector<1x4x4xf32> to vector<4x4xf32>
    %cst_96 = arith.constant dense<0.000000e+00> : vector<4x256xf32>
    %140 = tpu.matmul %139, %137, %cst_96 {dimension_numbers = #tpu.dot_dimension_numbers<[1], [0], [0], [1], [0, 0, 1, 1], [], []>} : vector<4x4xf32>, vector<4x256xf32>, vector<4x256xf32> -> vector<4x256xf32>
    %141 = arith.addf %132, %140 : vector<4x256xf32>
    %c4_97 = arith.constant 4 : index
    %c0_98 = arith.constant 0 : index
    %c0_99 = arith.constant 0 : index
    %142 = vector.load %arg6[%c4_97, %c0_98, %c0_99] : memref<9x4x4xf32, #tpu.memory_space<vmem>>, vector<1x4x4xf32>
    %143 = vector.shape_cast %142 : vector<1x4x4xf32> to vector<4x4xf32>
    %cst_100 = arith.constant dense<0.000000e+00> : vector<4x256xf32>
    %144 = tpu.matmul %143, %104, %cst_100 {dimension_numbers = #tpu.dot_dimension_numbers<[1], [0], [0], [1], [0, 0, 1, 1], [], []>} : vector<4x4xf32>, vector<4x256xf32>, vector<4x256xf32> -> vector<4x256xf32>
    %145 = arith.addf %141, %144 : vector<4x256xf32>
    %c255_i32_101 = arith.constant 255 : i32
    %146 = tpu.dynamic_rotate %104 by %c255_i32_101 dim 1 : vector<4x256xf32>, i32 -> vector<4x256xf32>
    %c5_102 = arith.constant 5 : index
    %c0_103 = arith.constant 0 : index
    %c0_104 = arith.constant 0 : index
    %147 = vector.load %arg2[%c5_102, %c0_103, %c0_104] : memref<9x1x256xf32, #tpu.memory_space<vmem>>, vector<1x1x256xf32>
    %148 = vector.shape_cast %147 : vector<1x1x256xf32> to vector<1x256xf32>
    %149 = vector.broadcast %148 : vector<1x256xf32> to vector<4x256xf32>
    %150 = arith.mulf %146, %149 : vector<4x256xf32>
    %c5_105 = arith.constant 5 : index
    %c0_106 = arith.constant 0 : index
    %c0_107 = arith.constant 0 : index
    %151 = vector.load %arg6[%c5_105, %c0_106, %c0_107] : memref<9x4x4xf32, #tpu.memory_space<vmem>>, vector<1x4x4xf32>
    %152 = vector.shape_cast %151 : vector<1x4x4xf32> to vector<4x4xf32>
    %cst_108 = arith.constant dense<0.000000e+00> : vector<4x256xf32>
    %153 = tpu.matmul %152, %150, %cst_108 {dimension_numbers = #tpu.dot_dimension_numbers<[1], [0], [0], [1], [0, 0, 1, 1], [], []>} : vector<4x4xf32>, vector<4x256xf32>, vector<4x256xf32> -> vector<4x256xf32>
    %154 = arith.addf %145, %153 : vector<4x256xf32>
    %c241_i32_109 = arith.constant 241 : i32
    %155 = tpu.dynamic_rotate %104 by %c241_i32_109 dim 1 : vector<4x256xf32>, i32 -> vector<4x256xf32>
    %c6_110 = arith.constant 6 : index
    %c0_111 = arith.constant 0 : index
    %c0_112 = arith.constant 0 : index
    %156 = vector.load %arg2[%c6_110, %c0_111, %c0_112] : memref<9x1x256xf32, #tpu.memory_space<vmem>>, vector<1x1x256xf32>
    %157 = vector.shape_cast %156 : vector<1x1x256xf32> to vector<1x256xf32>
    %158 = vector.broadcast %157 : vector<1x256xf32> to vector<4x256xf32>
    %159 = arith.mulf %155, %158 : vector<4x256xf32>
    %c6_113 = arith.constant 6 : index
    %c0_114 = arith.constant 0 : index
    %c0_115 = arith.constant 0 : index
    %160 = vector.load %arg6[%c6_113, %c0_114, %c0_115] : memref<9x4x4xf32, #tpu.memory_space<vmem>>, vector<1x4x4xf32>
    %161 = vector.shape_cast %160 : vector<1x4x4xf32> to vector<4x4xf32>
    %cst_116 = arith.constant dense<0.000000e+00> : vector<4x256xf32>
    %162 = tpu.matmul %161, %159, %cst_116 {dimension_numbers = #tpu.dot_dimension_numbers<[1], [0], [0], [1], [0, 0, 1, 1], [], []>} : vector<4x4xf32>, vector<4x256xf32>, vector<4x256xf32> -> vector<4x256xf32>
    %163 = arith.addf %154, %162 : vector<4x256xf32>
    %c240_i32_117 = arith.constant 240 : i32
    %164 = tpu.dynamic_rotate %104 by %c240_i32_117 dim 1 : vector<4x256xf32>, i32 -> vector<4x256xf32>
    %c7_118 = arith.constant 7 : index
    %c0_119 = arith.constant 0 : index
    %c0_120 = arith.constant 0 : index
    %165 = vector.load %arg2[%c7_118, %c0_119, %c0_120] : memref<9x1x256xf32, #tpu.memory_space<vmem>>, vector<1x1x256xf32>
    %166 = vector.shape_cast %165 : vector<1x1x256xf32> to vector<1x256xf32>
    %167 = vector.broadcast %166 : vector<1x256xf32> to vector<4x256xf32>
    %168 = arith.mulf %164, %167 : vector<4x256xf32>
    %c7_121 = arith.constant 7 : index
    %c0_122 = arith.constant 0 : index
    %c0_123 = arith.constant 0 : index
    %169 = vector.load %arg6[%c7_121, %c0_122, %c0_123] : memref<9x4x4xf32, #tpu.memory_space<vmem>>, vector<1x4x4xf32>
    %170 = vector.shape_cast %169 : vector<1x4x4xf32> to vector<4x4xf32>
    %cst_124 = arith.constant dense<0.000000e+00> : vector<4x256xf32>
    %171 = tpu.matmul %170, %168, %cst_124 {dimension_numbers = #tpu.dot_dimension_numbers<[1], [0], [0], [1], [0, 0, 1, 1], [], []>} : vector<4x4xf32>, vector<4x256xf32>, vector<4x256xf32> -> vector<4x256xf32>
    %172 = arith.addf %163, %171 : vector<4x256xf32>
    %c239_i32_125 = arith.constant 239 : i32
    %173 = tpu.dynamic_rotate %104 by %c239_i32_125 dim 1 : vector<4x256xf32>, i32 -> vector<4x256xf32>
    %c8_126 = arith.constant 8 : index
    %c0_127 = arith.constant 0 : index
    %c0_128 = arith.constant 0 : index
    %174 = vector.load %arg2[%c8_126, %c0_127, %c0_128] : memref<9x1x256xf32, #tpu.memory_space<vmem>>, vector<1x1x256xf32>
    %175 = vector.shape_cast %174 : vector<1x1x256xf32> to vector<1x256xf32>
    %176 = vector.broadcast %175 : vector<1x256xf32> to vector<4x256xf32>
    %177 = arith.mulf %173, %176 : vector<4x256xf32>
    %c8_129 = arith.constant 8 : index
    %c0_130 = arith.constant 0 : index
    %c0_131 = arith.constant 0 : index
    %178 = vector.load %arg6[%c8_129, %c0_130, %c0_131] : memref<9x4x4xf32, #tpu.memory_space<vmem>>, vector<1x4x4xf32>
    %179 = vector.shape_cast %178 : vector<1x4x4xf32> to vector<4x4xf32>
    %cst_132 = arith.constant dense<0.000000e+00> : vector<4x256xf32>
    %180 = tpu.matmul %179, %177, %cst_132 {dimension_numbers = #tpu.dot_dimension_numbers<[1], [0], [0], [1], [0, 0, 1, 1], [], []>} : vector<4x4xf32>, vector<4x256xf32>, vector<4x256xf32> -> vector<4x256xf32>
    %181 = arith.addf %172, %180 : vector<4x256xf32>
    %cst_133 = arith.constant dense<0.000000e+00> : vector<4xf32>
    %182 = vector.multi_reduction <add>, %181, %cst_133 [1] : vector<4x256xf32> to vector<4xf32>
    %183 = vector.shape_cast %182 : vector<4xf32> to vector<4x1xf32>
    %cst_134 = arith.constant 2.560000e+02 : f32
    %184 = vector.broadcast %cst_134 : f32 to vector<4x1xf32>
    %185 = arith.divf %183, %184 : vector<4x1xf32>
    %186 = vector.broadcast %185 : vector<4x1xf32> to vector<4x256xf32>
    %187 = arith.subf %181, %186 : vector<4x256xf32>
    %188 = arith.mulf %187, %187 : vector<4x256xf32>
    %cst_135 = arith.constant dense<0.000000e+00> : vector<4xf32>
    %189 = vector.multi_reduction <add>, %188, %cst_135 [1] : vector<4x256xf32> to vector<4xf32>
    %190 = vector.shape_cast %189 : vector<4xf32> to vector<4x1xf32>
    %cst_136 = arith.constant 2.560000e+02 : f32
    %191 = vector.broadcast %cst_136 : f32 to vector<4x1xf32>
    %192 = arith.divf %190, %191 : vector<4x1xf32>
    %193 = vector.broadcast %185 : vector<4x1xf32> to vector<4x256xf32>
    %194 = arith.subf %181, %193 : vector<4x256xf32>
    %cst_137 = arith.constant 9.99999974E-6 : f32
    %195 = vector.broadcast %cst_137 : f32 to vector<4x1xf32>
    %196 = arith.addf %192, %195 : vector<4x1xf32>
    %197 = math.rsqrt %196 : vector<4x1xf32>
    %198 = vector.broadcast %197 : vector<4x1xf32> to vector<4x256xf32>
    %199 = arith.mulf %194, %198 : vector<4x256xf32>
    %c0_138 = arith.constant 0 : index
    %c0_139 = arith.constant 0 : index
    %200 = vector.load %arg7[%c0_138, %c0_139] : memref<4x1xf32, #tpu.memory_space<vmem>>, vector<4x1xf32>
    %201 = vector.broadcast %200 : vector<4x1xf32> to vector<4x256xf32>
    %202 = arith.mulf %199, %201 : vector<4x256xf32>
    %c0_140 = arith.constant 0 : index
    %c0_141 = arith.constant 0 : index
    %203 = vector.load %arg8[%c0_140, %c0_141] : memref<4x1xf32, #tpu.memory_space<vmem>>, vector<4x1xf32>
    %204 = vector.broadcast %203 : vector<4x1xf32> to vector<4x256xf32>
    %205 = arith.addf %202, %204 : vector<4x256xf32>
    %206 = arith.addf %1, %205 : vector<4x256xf32>
    %c0_142 = arith.constant 0 : index
    %c0_143 = arith.constant 0 : index
    %c0_144 = arith.constant 0 : index
    %207 = vector.load %arg9[%c0_142, %c0_143, %c0_144] : memref<1x4x256xf32, #tpu.memory_space<vmem>>, vector<1x4x256xf32>
    %208 = vector.shape_cast %207 : vector<1x4x256xf32> to vector<4x256xf32>
    %209 = vector.shape_cast %206 : vector<4x256xf32> to vector<1x4x256xf32>
    tpu.vector_store %arg9[%c0_142, %c0_143, %c0_144], %209 {strides = array<i32>} : memref<1x4x256xf32, #tpu.memory_space<vmem>>, vector<1x4x256xf32>,
    return
  }
  func.func @transform_0(%arg0: i32) -> (i32, i32, i32) {
    %c0_i32 = arith.constant 0 : i32
    %c0_i32_0 = arith.constant 0 : i32
    %c0_i32_1 = arith.constant 0 : i32
    return %arg0, %c0_i32, %c0_i32_0 : i32, i32, i32
  }
  func.func @transform_1(%arg0: i32) -> (i32, i32, i32) {
    %c0_i32 = arith.constant 0 : i32
    %c0_i32_0 = arith.constant 0 : i32
    %c0_i32_1 = arith.constant 0 : i32
    %c0_i32_2 = arith.constant 0 : i32
    return %c0_i32, %c0_i32_0, %c0_i32_1 : i32, i32, i32
  }
  func.func @transform_2(%arg0: i32) -> (i32, i32, i32) {
    %c0_i32 = arith.constant 0 : i32
    %c0_i32_0 = arith.constant 0 : i32
    %c0_i32_1 = arith.constant 0 : i32
    %c0_i32_2 = arith.constant 0 : i32
    return %c0_i32, %c0_i32_0, %c0_i32_1 : i32, i32, i32
  }
  func.func @transform_3(%arg0: i32) -> (i32, i32) {
    %c0_i32 = arith.constant 0 : i32
    %c0_i32_0 = arith.constant 0 : i32
    %c0_i32_1 = arith.constant 0 : i32
    return %c0_i32, %c0_i32_0 : i32, i32
  }
  func.func @transform_4(%arg0: i32) -> (i32, i32) {
    %c0_i32 = arith.constant 0 : i32
    %c0_i32_0 = arith.constant 0 : i32
    %c0_i32_1 = arith.constant 0 : i32
    return %c0_i32, %c0_i32_0 : i32, i32
  }
  func.func @transform_5(%arg0: i32) -> (i32, i32, i32) {
    %c0_i32 = arith.constant 0 : i32
    %c0_i32_0 = arith.constant 0 : i32
    %c0_i32_1 = arith.constant 0 : i32
    %c0_i32_2 = arith.constant 0 : i32
    return %c0_i32, %c0_i32_0, %c0_i32_1 : i32, i32, i32
  }
  func.func @transform_6(%arg0: i32) -> (i32, i32) {
    %c0_i32 = arith.constant 0 : i32
    %c0_i32_0 = arith.constant 0 : i32
    %c0_i32_1 = arith.constant 0 : i32
    return %c0_i32, %c0_i32_0 : i32, i32
  }
  func.func @transform_7(%arg0: i32) -> (i32, i32) {
    %c0_i32 = arith.constant 0 : i32
    %c0_i32_0 = arith.constant 0 : i32
    %c0_i32_1 = arith.constant 0 : i32
    return %c0_i32, %c0_i32_0 : i32, i32
  }
  func.func @transform_8(%arg0: i32) -> (i32, i32, i32) {
    %c0_i32 = arith.constant 0 : i32
    %c0_i32_0 = arith.constant 0 : i32
    %c0_i32_1 = arith.constant 0 : i32
    return %arg0, %c0_i32, %c0_i32_0 : i32, i32, i32
  }
}

</mosaic_0001>

<bundles_post_ra>
// kernel: residual_block.1
= control target key start
LH: loop header
LB: loop body
LE: loop exit
PB: predicated region body
PF: predicated region fallthrough
CT: control target
= control target key end

     0   :  { %s2399_s27 = smov 0   ;;  %s2819_s0 = inlined_call_operand.vmem [shape: f32[2,4,256], index: 0, kind: input, shape index: {}]   ;;  %s2820_s1 = inlined_call_operand.vmem [shape: f32[9,1,256], index: 1, kind: input, shape index: {}]   ;;  %s2821_s2 = inlined_call_operand.vmem [shape: f32[9,4,4], index: 2, kind: input, shape index: {}]   ;;  %s2822_s3 = inlined_call_operand.vmem [shape: f32[4,1], index: 3, kind: input, shape index: {}]   ;;  %s2823_s4 = inlined_call_operand.vmem [shape: f32[4,1], index: 4, kind: input, shape index: {}]   ;;  %s2824_s5 = inlined_call_operand.vmem [shape: f32[9,4,4], index: 5, kind: input, shape index: {}]   ;;  %s2825_s6 = inlined_call_operand.vmem [shape: f32[4,1], index: 6, kind: input, shape index: {}]   ;;  %s2826_s7 = inlined_call_operand.vmem [shape: f32[4,1], index: 7, kind: input, shape index: {}]   ;;  %s2827_s8 = inlined_call_operand.vmem [shape: f32[2,4,256], index: 8, kind: output, shape index: {}]  }
   0x1 LB: > { %s2189_s28 = sadd.s32 4294967295, %s2342_s27   ;;  %p2193_p0 = scmp.ge.s32.totalorder %s2342_s27, 1  ;;  %s2342_s27 = sphi %s2399_s27, %s18_s27  }
   0x2   : > { %p262_p1 = scmp.lt.s32.totalorder %s2342_s27, 3 }
   0x4   : > { %p263_p2 = pnand %p2193_p0, %p262_p1 }
   0x5   : > { %p296_p3 = scmp.lt.s32.totalorder (!%p263_p2), %s2189_s28, 1  ;;  %v2344_v0 = vmov (!%p263_p2), 0.0   ;;  %s2345_s11 = smov (!%p263_p2), 16   ;;  %v314_v3 = vlaneseq (!%p263_p2)  ;;  %v2198_v8 = vld [vmem:[%s2820_s1 + $0x2] sm:$0x3] (!%p263_p2)  ;;  %vm362_vm2 = vcmask (!%p263_p2), 1043456  }
   0x6   : > { %266 = sbr.rel (%p263_p2) target bundleno = 1460 (0x5b4), region = 52  ;;  %433 = vmatprep.mubr.f32.mxu0 (!%p263_p2), %v2344_v0  ;;  %1369 = vmatprep.mubr.f32.mxu1 (!%p263_p2), %v2344_v0  ;;  %s2346_s12 = smov (!%p263_p2), 17   ;;  %v319_v9 = vld [vmem:[%s2820_s1] sm:$0x3] (!%p263_p2)  ;;  %v2206_v16 = vld [vmem:[%s2820_s1 + $0x4] sm:$0x3] (!%p263_p2) }
   0x7   : > { %s2347_s13 = smov (!%p263_p2), 15   ;;  %s2348_s14 = smov (!%p263_p2), 1   ;;  %v322_v4 = vshrl.u32 (!%p263_p2), %v314_v3, 7  ;;  %v2455_v5 = vand.u32 (!%p263_p2), 127, %v314_v3  ;;  %v2199_v28 = vld [vmem:[%s2821_s2 + $0x4] sm:$0xf] (!%p263_p2) }
   0x8   : > { %s2349_s15 = smov (!%p263_p2), 127   ;;  %s2350_s16 = smov (!%p263_p2), 113   ;;  %vm358_vm4 = vcmask (!%p263_p2), 31744   ;;  %v2211_v32 = vld [vmem:[%s2820_s1 + $0x6] sm:$0x3] (!%p263_p2) }
   0x9   : > { %s2351_s17 = smov (!%p263_p2), 112   ;;  %s2352_s18 = smov (!%p263_p2), 111   ;;  %v2457_v6 = vsub.s32 (!%p263_p2), 0, %v322_v4  ;;  %v2459_v7 = vsub.s32 (!%p263_p2), 1, %v322_v4  ;;  %vm338_vm0 = vcmp.lt.s32.totalorder (!%p263_p2), %v2455_v5, 16  ;;  %vm316_vm1 = vcmp.lt.s32.totalorder (!%p263_p2), %v2455_v5, 17 }
   0xa   : > { %vm524_vm3 = vcmp.lt.s32.totalorder (!%p263_p2), %v2455_v5, 15  ;;  %vm630_vm5 = vcmp.lt.s32.totalorder (!%p263_p2), %v2455_v5, 1  ;;  %v333_v40 = vld [vmem:[%s2821_s2] sm:$0xf] (!%p263_p2)  ;;  %v2207_v45 = vld [vmem:[%s2821_s2 + $0x8] sm:$0xf] (!%p263_p2) }
   0xb   : > { %v2469_v12 = vrot.slane (!%p263_p2), %v2198_v8, %v2457_v6  ;;  %v2473_v13 = vrot.slane (!%p263_p2), %v319_v9, %v2459_v7  ;;  %v2476_v14 = vrot.slane (!%p263_p2), %v2198_v8, %v2459_v7  ;;  %v2479_v15 = vrot.slane (!%p263_p2), %v319_v9, %v2457_v6  ;;  %v2220_v47 = vld [vmem:[%s2820_s1 + $0xa] sm:$0x3] (!%p263_p2)  ;;  %v2212_v52 = vld [vmem:[%s2821_s2 + $0xc] sm:$0xf] (!%p263_p2)  ;;  %v2216_v61 = vld [vmem:[%s2821_s2 + $0x10] sm:$0xf] (!%p263_p2) }
   0xc   : > { %v2497_v26 = vrot.slane (!%p263_p2), %v2206_v16, %v2459_v7  ;;  %v2517_v34 = vrot.slane (!%p263_p2), %v2206_v16, %v2457_v6  ;;  %v2523_v37 = vrot.slane (!%p263_p2), %v2211_v32, %v2459_v7  ;;  %v2536_v43 = vrot.slane (!%p263_p2), %v2211_v32, %v2457_v6  ;;  %v2225_v54 = vld [vmem:[%s2820_s1 + $0xc] sm:$0x3] (!%p263_p2)  ;;  %v2221_v16 = vld [vmem:[%s2821_s2 + $0x14] sm:$0xf] (!%p263_p2) }
   0xd   : > { %s2829_s28 = smov (!%p296_p3, %s2189_s28), 1  ;;  %vm818_vm6 = vcmp.lt.s32.totalorder %v2455_v5, 127  ;;  %v2555_v50 = vrot.slane %v2220_v47, %v2459_v7  ;;  %vm924_vm7 = vcmp.lt.s32.totalorder %v2455_v5, 113  ;;  %v2572_v57 = vrot.slane %v2220_v47, %v2457_v6 }
   0xe   : > { %s2277_s29 = sshll.u32 %s2829_s28, 3  ;;  %v2578_v59 = vrot.slane %v2225_v54, %v2459_v7  ;;  %vm1030_vm8 = vcmp.lt.s32.totalorder %v2455_v5, 112  ;;  %v2595_v8 = vrot.slane %v2225_v54, %v2457_v6  ;;  %vm1136_vm9 = vcmp.lt.s32.totalorder %v2455_v5, 111 }
   0xf   : > { %s300_s10 = scalar_lea.vmem %s2819_s0, %s2277_s29 }
  0x10   : > { %v2417_v1 = vld [vmem:[%s300_s10] sm:$0xff] }
  0x11   : > { %334 = vrot.lane.b32.xlu0 %v2417_v1, %s2345_s11  ;;  %310 = vrot.lane.b32.xlu1 %v2417_v1, %s2346_s12  ;;  %v2425_v2 = vcombine.high %v2417_v1, %v2417_v1 }
  0x15   : > { %336 = vrot.lane.b32.xlu0 %v2425_v2, %s2345_s11  ;;  %312 = vrot.lane.b32.xlu1 %v2425_v2, %s2346_s12 }
  0x19   : > { %522 = vrot.lane.b32.xlu1 %v2425_v2, %s2347_s13  ;;  %520 = vrot.lane.b32.xlu0 %v2417_v1, %s2347_s13 }
  0x1d   : > { %628 = vrot.lane.b32.xlu1 %v2425_v2, %s2348_s14  ;;  %626 = vrot.lane.b32.xlu0 %v2417_v1, %s2348_s14 }
  0x21   : > { %816 = vrot.lane.b32.xlu1 %v2425_v2, %s2349_s15  ;;  %814 = vrot.lane.b32.xlu0 %v2417_v1, %s2349_s15 }
  0x25   : > { %922 = vrot.lane.b32.xlu1 %v2425_v2, %s2350_s16  ;;  %920 = vrot.lane.b32.xlu0 %v2417_v1, %s2350_s16 }
  0x29   : > { %1028 = vrot.lane.b32.xlu1 %v2425_v2, %s2351_s17  ;;  %1026 = vrot.lane.b32.xlu0 %v2417_v1, %s2351_s17 }
  0x2d   : > { %1134 = vrot.lane.b32.xlu1 %v2425_v2, %s2352_s18  ;;  %1132 = vrot.lane.b32.xlu0 %v2417_v1, %s2352_s18 }
  0x83   : > { %v335_v10 = vpop.permute.xlu0 %334  ;;  %v311_v11 = vpop.permute.xlu1 %310 }
  0x87   : > { %v337_v17 = vpop.permute.xlu0 %336  ;;  %v313_v18 = vpop.permute.xlu1 %312 }
  0x88   : > { %v339_v19 = vsel %vm338_vm0, %v335_v10, %v337_v17  ;;  %v340_v20 = vsel %vm338_vm0, %v337_v17, %v335_v10  ;;  %v317_v21 = vsel %vm316_vm1, %v311_v11, %v313_v18  ;;  %v318_v22 = vsel %vm316_vm1, %v313_v18, %v311_v11 }
  0x89   : > { %v354_v23 = vmul.f32 %v2469_v12, %v340_v20  ;;  %v332_v24 = vmul.f32 %v2473_v13, %v317_v21  ;;  %v355_v25 = vmul.f32 %v2476_v14, %v339_v19  ;;  %v331_v27 = vmul.f32 %v2479_v15, %v318_v22  ;;  %v2235_v19 = vld [vmem:[%s2820_s1 + $0x10] sm:$0x3] }
  0x8b   : > { %2200 = vmatprep.subr.msk.mxu0 %vm362_vm2, %v355_v25  ;;  %v523_v29 = vpop.permute.xlu1 %522  ;;  %v521_v30 = vpop.permute.xlu0 %520 }
  0x8c   : > { %2201 = vmatpush1.msk.msra.mxu0 %vm362_vm2, %v354_v23  ;;  %v525_v31 = vsel %vm524_vm3, %v521_v30, %v523_v29  ;;  %v526_v35 = vsel %vm524_vm3, %v523_v29, %v521_v30 }
  0x8d   : > { %2202 = vmatmul.mubr.msk.f32.vlgmr.msra.gmra.mrb[0].mxu0 %vm358_vm4, %v2199_v28  ;;  %2203 = vmatprep.subr.msk.mxu0 %vm362_vm2, %v332_v24  ;;  %v541_v33 = vmul.f32 %v2497_v26, %v525_v31  ;;  %v540_v41 = vmul.f32 %v2517_v34, %v526_v35  ;;  %v2624_v24 = vrot.slane %v2235_v19, %v2459_v7  ;;  %v2231_v31 = vld [vmem:[%s2821_s2 + $0x1c] sm:$0xf] }
  0x8e   : > { %2204 = vmatpush1.msk.msra.mxu0 %vm362_vm2, %v331_v27  ;;  %513 = vmatprep.mubr.f32.mxu0 %v2344_v0  ;;  %v2226_v27 = vld [vmem:[%s2821_s2 + $0x18] sm:$0xf] }
  0x8f   : > { %2208 = vmatprep.subr.msk.mxu0 %vm362_vm2, %v541_v33  ;;  %v629_v36 = vpop.permute.xlu1 %628  ;;  %v627_v38 = vpop.permute.xlu0 %626 }
  0x90   : > { %v631_v39 = vsel %vm630_vm5, %v627_v38, %v629_v36  ;;  %v632_v44 = vsel %vm630_vm5, %v629_v36, %v627_v38 }
  0x91   : > { %v647_v42 = vmul.f32 %v2523_v37, %v631_v39  ;;  %v646_v46 = vmul.f32 %v2536_v43, %v632_v44 }
  0x93   : > { %v817_v48 = vpop.permute.xlu1 %816  ;;  %v815_v49 = vpop.permute.xlu0 %814 }
  0x94   : > { %v820_v51 = vsel %vm818_vm6, %v817_v48, %v815_v49  ;;  %v819_v58 = vsel %vm818_vm6, %v815_v49, %v817_v48 }
  0x95   : > { %2205 = vmatmul.mubr.msk.f32.vlgmr.msra.gmra.mrb[0].mxu0 %vm358_vm4, %v333_v40  ;;  %v835_v53 = vmul.f32 %v2555_v50, %v820_v51  ;;  %v834_v62 = vmul.f32 %v2572_v57, %v819_v58  ;;  %v1259_v40 = vld [vmem:[%s2822_s3] sm:$0xf] }
  0x96   : > { %2209 = vmatpush1.msk.msra.mxu0 %vm362_vm2, %v540_v41  ;;  %617 = vmatprep.mubr.f32.mxu0 %v2344_v0  ;;  %v2353_v41 = vmov 0  }
  0x97   : > { %2213 = vmatprep.subr.msk.mxu0 %vm362_vm2, %v647_v42  ;;  %v923_v55 = vpop.permute.xlu1 %922  ;;  %v921_v56 = vpop.permute.xlu0 %920  ;;  %2329 = vset.pattern.permute.xlu0 %v2353_v41 }
  0x98   : > { %v926_v60 = vsel %vm924_vm7, %v923_v55, %v921_v56  ;;  %v925_v9 = vsel %vm924_vm7, %v921_v56, %v923_v55  ;;  %2330 = vset.pattern.permute.xlu1 %v2353_v41 }
  0x99   : > { %v941_v63 = vmul.f32 %v2578_v59, %v926_v60  ;;  %v940_v17 = vmul.f32 %v2595_v8, %v925_v9 }
  0x9b   : > { %v1029_v3 = vpop.permute.xlu1 %1028  ;;  %v1027_v4 = vpop.permute.xlu0 %1026 }
  0x9c   : > { %v1032_v11 = vsel %vm1030_vm8, %v1029_v3, %v1027_v4  ;;  %v1031_v23 = vsel %vm1030_vm8, %v1027_v4, %v1029_v3 }
  0x9d   : > { %2210 = vmatmul.mubr.msk.f32.vlgmr.msra.gmra.mrb[0].mxu0 %vm358_vm4, %v2207_v45 }
  0x9e   : > { %2214 = vmatpush1.msk.msra.mxu0 %vm362_vm2, %v646_v46  ;;  %723 = vmatprep.mubr.f32.mxu0 %v2344_v0 }
  0x9f   : > { %2217 = vmatprep.subr.msk.mxu0 %vm362_vm2, %v2425_v2  ;;  %v2230_v2 = vld [vmem:[%s2820_s1 + $0xe] sm:$0x3]  ;;  %v1135_v20 = vpop.permute.xlu1 %1134  ;;  %v1133_v21 = vpop.permute.xlu0 %1132 }
  0xa0   : > { %v2601_v10 = vrot.slane %v2230_v2, %v2459_v7  ;;  %v2618_v22 = vrot.slane %v2230_v2, %v2457_v6  ;;  %v1138_v25 = vsel %vm1136_vm9, %v1135_v20, %v1133_v21  ;;  %v2637_v7 = vrot.slane %v2235_v19, %v2457_v6  ;;  %v2236_v6 = vld [vmem:[%s2821_s2 + $0x20] sm:$0xf] }
  0xa1   : > { %v1153_v29 = vmul.f32 %v2624_v24, %v1138_v25  ;;  %v1137_v30 = vsel %vm1136_vm9, %v1133_v21, %v1135_v20  ;;  %v2240_v25 = vld [vmem:[%s2824_s5 + $0x4] sm:$0xf] }
  0xa2   : > { %v1047_v18 = vmul.f32 %v2601_v10, %v1032_v11  ;;  %v1046_v28 = vmul.f32 %v2618_v22, %v1031_v23  ;;  %v1152_v32 = vmul.f32 %v2637_v7, %v1137_v30 }
  0xa5   : > { %2215 = vmatmul.mubr.msk.f32.vlgmr.msra.gmra.mrb[0].mxu0 %vm358_vm4, %v2212_v52 }
  0xa6   : > { %2218 = vmatpush1.msk.msra.mxu0 %vm362_vm2, %v2417_v1  ;;  %805 = vmatprep.mubr.f32.mxu0 %v2344_v0 }
  0xa7   : > { %2222 = vmatprep.subr.msk.mxu0 %vm362_vm2, %v835_v53  ;;  %v1267_v53 = vld [vmem:[%s2823_s4] sm:$0xf] }
  0xad   : > { %2219 = vmatmul.mubr.msk.f32.vlgmr.msra.gmra.mrb[0].mxu0 %vm358_vm4, %v2216_v61 }
  0xae   : > { %2223 = vmatpush1.msk.msra.mxu0 %vm362_vm2, %v834_v62  ;;  %911 = vmatprep.mubr.f32.mxu0 %v2344_v0 }
  0xaf   : > { %2227 = vmatprep.subr.msk.mxu0 %vm362_vm2, %v941_v63 }
  0xb5   : > { %2224 = vmatmul.mubr.msk.f32.vlgmr.msra.gmra.mrb[0].mxu0 %vm358_vm4, %v2221_v16 }
  0xb6   : > { %2228 = vmatpush1.msk.msra.mxu0 %vm362_vm2, %v940_v17  ;;  %1017 = vmatprep.mubr.f32.mxu0 %v2344_v0 }
  0xb7   : > { %2232 = vmatprep.subr.msk.mxu0 %vm362_vm2, %v1047_v18 }
  0xbd   : > { %2229 = vmatmul.mubr.msk.f32.vlgmr.msra.gmra.mrb[0].mxu0 %vm358_vm4, %v2226_v27 }
  0xbe   : > { %2233 = vmatpush1.msk.msra.mxu0 %vm362_vm2, %v1046_v28  ;;  %1123 = vmatprep.mubr.f32.mxu0 %v2344_v0 }
  0xbf   : > { %2237 = vmatprep.subr.msk.mxu0 %vm362_vm2, %v1153_v29 }
  0xc5   : > { %2234 = vmatmul.mubr.msk.f32.vlgmr.msra.gmra.mrb[0].mxu0 %vm358_vm4, %v2231_v31  ;;  %v1285_v31 = vld [vmem:[%s2824_s5] sm:$0xf] }
  0xc6   : > { %2238 = vmatpush1.msk.msra.mxu0 %vm362_vm2, %v1152_v32  ;;  %1229 = vmatprep.mubr.f32.mxu0 %v2344_v0 }
  0xcd   : > { %2239 = vmatmul.mubr.msk.f32.vlgmr.msra.gmra.mrb[0].mxu0 %vm358_vm4, %v2236_v6 }
 0x1a0   : > { %v1231_v33 = vpop.f32.mrb[0].mxu0 }
 0x1a1   : > { %v1238_v35 = vsel %vm362_vm2, %v1231_v33, 0.0  ;;  %v1233_v36 = vpop.f32.mrb[1].mxu0 }
 0x1a2   : > { %v1239_v38 = vsel %vm362_vm2, %v1233_v36, 0.0 }
 0x1a3   : > { %v1240_v39 = vadd.f32 %v1239_v38, %v1238_v35 }
 0x1a5   : > { %1241 = vadd.xlane.f32.xlu0 %v1240_v39 }
 0x1bb   : > { %1262 = vperm.xlu0 %2329, %v1259_v40  }
 0x232   : > { %v1242_v42 = vpop.xlane.xlu0 %1241 }
 0x233   : > { %v1244_v44 = vmul.f32 0.00390625, %v1242_v42 }
 0x235   : > { %v1245_v45 = vsub.f32 %v1231_v33, %v1244_v44  ;;  %v1246_v46 = vsub.f32 %v1233_v36, %v1244_v44  ;;  %v2247_v36 = vld [vmem:[%s2824_s5 + $0x8] sm:$0xf] }
 0x237   : > { %v1247_v47 = vmul.f32 %v1245_v45, %v1245_v45  ;;  %v1248_v48 = vmul.f32 %v1246_v46, %v1246_v46 }
 0x239   : > { %v1249_v49 = vsel %vm362_vm2, %v1247_v47, 0.0  ;;  %v1250_v51 = vsel %vm362_vm2, %v1248_v48, 0.0 }
 0x23a   : > { %v1251_v52 = vadd.f32 %v1250_v51, %v1249_v49  ;;  %v1263_v60 = vpop.permute.xlu0 %1262 }
 0x23c   : > { %1252 = vadd.xlane.f32.xlu1 %v1251_v52 }
 0x24d   : > { %1270 = vperm.xlu1 %2330, %v1267_v53  }
 0x2c9   : > { %v1253_v54 = vpop.xlane.xlu1 %1252 }
 0x2ca   : > { %v1254_v55 = vmul.f32 0.00390625, %v1253_v54 }
 0x2cc   : > { %v1255_v56 = vadd.f32 1e-05, %v1254_v55 }
 0x2cd   : > { %v1271_v63 = vpop.permute.xlu1 %1270 }
 0x2ce   : > { %2332 = vrsqrt.f32 %v1255_v56 }
 0x2d8   : > { %v2333_v58 = vpop.eup %2332 }
 0x2d9   : > { %v1257_v61 = vmul.f32 %v2333_v58, %v1245_v45  ;;  %v1258_v62 = vmul.f32 %v2333_v58, %v1246_v46 }
 0x2db   : > { %v1265_v2 = vmul.f32 %v1263_v60, %v1257_v61  ;;  %v1266_v3 = vmul.f32 %v1263_v60, %v1258_v62 }
 0x2dd   : > { %v1273_v4 = vadd.f32 %v1271_v63, %v1265_v2  ;;  %v1274_v9 = vadd.f32 %v1271_v63, %v1266_v3 }
 0x2df   : > { %v2663_v11 = vmax.f32 %v1273_v4, 0.0  ;;  %v1276_v16 = vmax.f32 %v1274_v9, 0.0  ;;  %v2267_v4 = vld [vmem:[%s2824_s5 + $0x1c] sm:$0xf] }
 0x2e1   : > { %1548 = vrot.lane.b32.xlu0 %v2663_v11, %s2348_s14  ;;  %1286 = vrot.lane.b32.xlu1 %v2663_v11, %s2345_s11 }
 0x2e5   : > { %1724 = vrot.lane.b32.xlu0 %v2663_v11, %s2349_s15  ;;  %1288 = vrot.lane.b32.xlu1 %v1276_v16, %s2345_s11 }
 0x2e9   : > { %1816 = vrot.lane.b32.xlu0 %v2663_v11, %s2350_s16  ;;  %1277 = vrot.lane.b32.xlu1 %v2663_v11, %s2346_s12 }
 0x2ed   : > { %1908 = vrot.lane.b32.xlu0 %v2663_v11, %s2351_s17  ;;  %1279 = vrot.lane.b32.xlu1 %v1276_v16, %s2346_s12 }
 0x2f1   : > { %2000 = vrot.lane.b32.xlu0 %v2663_v11, %s2352_s18  ;;  %1456 = vrot.lane.b32.xlu1 %v2663_v11, %s2347_s13 }
 0x2f5   : > { %1458 = vrot.lane.b32.xlu1 %v1276_v16, %s2347_s13 }
 0x2f9   : > { %1550 = vrot.lane.b32.xlu1 %v1276_v16, %s2348_s14 }
 0x2fd   : > { %1726 = vrot.lane.b32.xlu1 %v1276_v16, %s2349_s15 }
 0x301   : > { %1818 = vrot.lane.b32.xlu1 %v1276_v16, %s2350_s16  ;;  %s305_s16 = scalar_lea.vmem %s2827_s8, %s2277_s29 }
 0x305   : > { %1910 = vrot.lane.b32.xlu1 %v1276_v16, %s2351_s17 }
 0x309   : > { %2002 = vrot.lane.b32.xlu1 %v1276_v16, %s2352_s18 }
 0x353   : > { %v1287_v17 = vpop.permute.xlu1 %1286  ;;  %v1549_v38 = vpop.permute.xlu0 %1548 }
 0x357   : > { %v1289_v18 = vpop.permute.xlu1 %1288  ;;  %v1725_v44 = vpop.permute.xlu0 %1724 }
 0x358   : > { %v1290_v19 = vsel %vm338_vm0, %v1287_v17, %v1289_v18  ;;  %v1291_v20 = vsel %vm338_vm0, %v1289_v18, %v1287_v17 }
 0x359   : > { %v1292_v21 = vmul.f32 %v1291_v20, %v2469_v12  ;;  %v1293_v23 = vmul.f32 %v1290_v19, %v2476_v14 }
 0x35b   : > { %2241 = vmatprep.subr.msk.mxu1 %vm362_vm2, %v1293_v23  ;;  %v1278_v27 = vpop.permute.xlu1 %1277  ;;  %v1817_v47 = vpop.permute.xlu0 %1816 }
 0x35c   : > { %2242 = vmatpush1.msk.msra.mxu1 %vm362_vm2, %v1292_v21 }
 0x35d   : > { %2243 = vmatmul.mubr.msk.f32.vlgmr.msra.gmra.mrb[0].mxu1 %vm358_vm4, %v2240_v25 }
 0x35e   : > { %1449 = vmatprep.mubr.f32.mxu1 %v2344_v0 }
 0x35f   : > { %v1280_v28 = vpop.permute.xlu1 %1279  ;;  %v1909_v54 = vpop.permute.xlu0 %1908 }
 0x360   : > { %v1281_v29 = vsel %vm316_vm1, %v1278_v27, %v1280_v28  ;;  %v1282_v12 = vsel %vm316_vm1, %v1280_v28, %v1278_v27 }
 0x361   : > { %v1283_v14 = vmul.f32 %v1282_v12, %v2479_v15  ;;  %v1284_v30 = vmul.f32 %v1281_v29, %v2473_v13  ;;  %v2120_v29 = vld [vmem:[%s2826_s7] sm:$0xf] }
 0x363   : > { %2244 = vmatprep.subr.msk.mxu1 %vm362_vm2, %v1284_v30  ;;  %v1457_v32 = vpop.permute.xlu1 %1456  ;;  %v2001_v61 = vpop.permute.xlu0 %2000 }
 0x364   : > { %2245 = vmatpush1.msk.msra.mxu1 %vm362_vm2, %v1283_v14 }
 0x365   : > { %2246 = vmatmul.mubr.msk.f32.vlgmr.msra.gmra.mrb[0].mxu1 %vm358_vm4, %v1285_v31 }
 0x366   : > { %1539 = vmatprep.mubr.f32.mxu1 %v2344_v0 }
 0x367   : > { %v1459_v6 = vpop.permute.xlu1 %1458 }
 0x368   : > { %v1460_v33 = vsel %vm524_vm3, %v1457_v32, %v1459_v6  ;;  %v1461_v13 = vsel %vm524_vm3, %v1459_v6, %v1457_v32 }
 0x369   : > { %v1462_v15 = vmul.f32 %v1461_v13, %v2517_v34  ;;  %v1463_v35 = vmul.f32 %v1460_v33, %v2497_v26 }
 0x36b   : > { %2248 = vmatprep.subr.msk.mxu1 %vm362_vm2, %v1463_v35  ;;  %v1551_v39 = vpop.permute.xlu1 %1550 }
 0x36c   : > { %v1552_v40 = vsel %vm630_vm5, %v1549_v38, %v1551_v39  ;;  %v1553_v41 = vsel %vm630_vm5, %v1551_v39, %v1549_v38  ;;  %2249 = vmatpush1.msk.msra.mxu1 %vm362_vm2, %v1462_v15 }
 0x36d   : > { %v1554_v34 = vmul.f32 %v1553_v41, %v2536_v43  ;;  %v1555_v26 = vmul.f32 %v1552_v40, %v2523_v37  ;;  %2250 = vmatmul.mubr.msk.f32.vlgmr.msra.gmra.mrb[0].mxu1 %vm358_vm4, %v2247_v36  ;;  %v2251_v43 = vld [vmem:[%s2824_s5 + $0xc] sm:$0xf] }
 0x36e   : > { %1631 = vmatprep.mubr.f32.mxu1 %v2344_v0 }
 0x36f   : > { %2252 = vmatprep.subr.msk.mxu1 %vm362_vm2, %v1555_v26  ;;  %v1727_v42 = vpop.permute.xlu1 %1726 }
 0x370   : > { %2253 = vmatpush1.msk.msra.mxu1 %vm362_vm2, %v1554_v34  ;;  %v1729_v45 = vsel %vm818_vm6, %v1727_v42, %v1725_v44  ;;  %v1728_v48 = vsel %vm818_vm6, %v1725_v44, %v1727_v42 }
 0x371   : > { %2256 = vmatprep.subr.msk.mxu1 %vm362_vm2, %v1276_v16  ;;  %v1731_v37 = vmul.f32 %v1729_v45, %v2555_v50  ;;  %v2255_v50 = vld [vmem:[%s2824_s5 + $0x10] sm:$0xf]  ;;  %v1730_v51 = vmul.f32 %v1728_v48, %v2572_v57  ;;  %v2259_v57 = vld [vmem:[%s2824_s5 + $0x14] sm:$0xf] }
 0x373   : > { %v1819_v46 = vpop.permute.xlu1 %1818 }
 0x374   : > { %v1821_v49 = vsel %vm924_vm7, %v1819_v46, %v1817_v47  ;;  %v1820_v55 = vsel %vm924_vm7, %v1817_v47, %v1819_v46 }
 0x375   : > { %2254 = vmatmul.mubr.msk.f32.vlgmr.msra.gmra.mrb[0].mxu1 %vm358_vm4, %v2251_v43  ;;  %v1823_v52 = vmul.f32 %v1821_v49, %v2578_v59  ;;  %v1822_v59 = vmul.f32 %v1820_v55, %v2595_v8  ;;  %v2263_v8 = vld [vmem:[%s2824_s5 + $0x18] sm:$0xf] }
 0x376   : > { %2257 = vmatpush1.msk.msra.mxu1 %vm362_vm2, %v2663_v11  ;;  %1715 = vmatprep.mubr.f32.mxu1 %v2344_v0 }
 0x377   : > { %2260 = vmatprep.subr.msk.mxu1 %vm362_vm2, %v1731_v37  ;;  %v1911_v53 = vpop.permute.xlu1 %1910 }
 0x378   : > { %v1913_v56 = vsel %vm1030_vm8, %v1911_v53, %v1909_v54  ;;  %v1912_v62 = vsel %vm1030_vm8, %v1909_v54, %v1911_v53 }
 0x379   : > { %v1915_v58 = vmul.f32 %v1913_v56, %v2601_v10  ;;  %v1914_v10 = vmul.f32 %v1912_v62, %v2618_v22  ;;  %v2271_v22 = vld [vmem:[%s2824_s5 + $0x20] sm:$0xf] }
 0x37b   : > { %v2003_v60 = vpop.permute.xlu1 %2002 }
 0x37c   : > { %v2005_v63 = vsel %vm1136_vm9, %v2003_v60, %v2001_v61  ;;  %v2004_v3 = vsel %vm1136_vm9, %v2001_v61, %v2003_v60 }
 0x37d   : > { %2258 = vmatmul.mubr.msk.f32.vlgmr.msra.gmra.mrb[0].mxu1 %vm358_vm4, %v2255_v50  ;;  %v2007_v2 = vmul.f32 %v2005_v63, %v2624_v24  ;;  %v2006_v9 = vmul.f32 %v2004_v3, %v2637_v7  ;;  %v2112_v7 = vld [vmem:[%s2825_s6] sm:$0xf] }
 0x37e   : > { %2261 = vmatpush1.msk.msra.mxu1 %vm362_vm2, %v1730_v51  ;;  %1807 = vmatprep.mubr.f32.mxu1 %v2344_v0 }
 0x37f   : > { %2264 = vmatprep.subr.msk.mxu1 %vm362_vm2, %v1823_v52 }
 0x385   : > { %2262 = vmatmul.mubr.msk.f32.vlgmr.msra.gmra.mrb[0].mxu1 %vm358_vm4, %v2259_v57 }
 0x386   : > { %2265 = vmatpush1.msk.msra.mxu1 %vm362_vm2, %v1822_v59  ;;  %1899 = vmatprep.mubr.f32.mxu1 %v2344_v0 }
 0x387   : > { %2268 = vmatprep.subr.msk.mxu1 %vm362_vm2, %v1915_v58 }
 0x38d   : > { %2266 = vmatmul.mubr.msk.f32.vlgmr.msra.gmra.mrb[0].mxu1 %vm358_vm4, %v2263_v8 }
 0x38e   : > { %2269 = vmatpush1.msk.msra.mxu1 %vm362_vm2, %v1914_v10  ;;  %1991 = vmatprep.mubr.f32.mxu1 %v2344_v0 }
 0x38f   : > { %2272 = vmatprep.subr.msk.mxu1 %vm362_vm2, %v2007_v2 }
 0x395   : > { %2270 = vmatmul.mubr.msk.f32.vlgmr.msra.gmra.mrb[0].mxu1 %vm358_vm4, %v2267_v4 }
 0x396   : > { %2273 = vmatpush1.msk.msra.mxu1 %vm362_vm2, %v2006_v9  ;;  %2083 = vmatprep.mubr.f32.mxu1 %v2344_v0 }
 0x39d   : > { %2274 = vmatmul.mubr.msk.f32.vlgmr.msra.gmra.mrb[0].mxu1 %vm358_vm4, %v2271_v22 }
 0x470   : > { %v2085_v5 = vpop.f32.mrb[0].mxu1 }
 0x471   : > { %v2092_v24 = vsel %vm362_vm2, %v2085_v5, 0.0  ;;  %v2087_v11 = vpop.f32.mrb[1].mxu1 }
 0x472   : > { %v2093_v16 = vsel %vm362_vm2, %v2087_v11, 0.0 }
 0x473   : > { %v2094_v17 = vadd.f32 %v2093_v16, %v2092_v24 }
 0x475   : > { %2095 = vadd.xlane.f32.xlu0 %v2094_v17 }
 0x48b   : > { %2115 = vperm.xlu0 %2329, %v2112_v7  }
 0x502   : > { %v2096_v0 = vpop.xlane.xlu0 %2095 }
 0x503   : > { %v2097_v18 = vmul.f32 0.00390625, %v2096_v0 }
 0x505   : > { %v2098_v19 = vsub.f32 %v2085_v5, %v2097_v18  ;;  %v2099_v20 = vsub.f32 %v2087_v11, %v2097_v18 }
 0x507   : > { %v2100_v21 = vmul.f32 %v2098_v19, %v2098_v19  ;;  %v2101_v23 = vmul.f32 %v2099_v20, %v2099_v20 }
 0x509   : > { %v2102_v25 = vsel %vm362_vm2, %v2100_v21, 0.0  ;;  %v2103_v27 = vsel %vm362_vm2, %v2101_v23, 0.0 }
 0x50a   : > { %v2104_v28 = vadd.f32 %v2103_v27, %v2102_v25  ;;  %v2116_v33 = vpop.permute.xlu0 %2115 }
 0x50c   : > { %2105 = vadd.xlane.f32.xlu1 %v2104_v28 }
 0x51d   : > { %2123 = vperm.xlu1 %2330, %v2120_v29  }
 0x599   : > { %v2106_v12 = vpop.xlane.xlu1 %2105 }
 0x59a   : > { %v2107_v14 = vmul.f32 0.00390625, %v2106_v12 }
 0x59c   : > { %v2108_v30 = vadd.f32 1e-05, %v2107_v14 }
 0x59d   : > { %v2124_v35 = vpop.permute.xlu1 %2123 }
 0x59e   : > { %2334 = vrsqrt.f32 %v2108_v30 }
 0x5a8   : > { %v2335_v31 = vpop.eup %2334 }
 0x5a9   : > { %v2110_v32 = vmul.f32 %v2335_v31, %v2098_v19  ;;  %v2111_v6 = vmul.f32 %v2335_v31, %v2099_v20 }
 0x5ab   : > { %v2118_v13 = vmul.f32 %v2116_v33, %v2110_v32  ;;  %v2119_v15 = vmul.f32 %v2116_v33, %v2111_v6 }
 0x5ad   : > { %v2126_v36 = vadd.f32 %v2124_v35, %v2118_v13  ;;  %v2127_v38 = vadd.f32 %v2124_v35, %v2119_v15 }
 0x5af   : > { %v2130_v39 = vcombine.low %v2126_v36, %v2127_v38 }
 0x5b1   : > { %v2132_v40 = vadd.f32 %v2130_v39, %v2417_v1 }
 0x5b3   : > { %2133 = vst [vmem:[%s305_s16] sm:$0xff] %v2132_v40 }
 0x5b4 PF: > { %s18_s27 = sadd.s32 1, %s2342_s27  }
 0x5b5   : > { %p15_p4 = scmp.ge.s32.totalorder %s18_s27, 4  }
 0x5b7   :  { %17 = sbr.rel (!%p15_p4) target bundleno = 1 (0x1), region = 105 }

</bundles_post_ra>
